<compile_context>
chip_gen: v5e
topology: v5e:2x2
jax: 0.10.0
libtpu: 0.0.40
codegen_flags: <defaults>
</compile_context>

<pallas_src>
import jax
import jax.numpy as jnp
from jax.experimental import pallas as pl
from jax.experimental.pallas import tpu as pltpu


def _round_up(n, m):
    return -(-n // m) * m


def dqn_kernel(x_ref, w1_ref, b1_ref, w2_ref, b2_ref, w3_ref, b3_ref, o_ref):
    # fc1 -> relu   (bf16 matmul operands, f32 accumulate / bias / ReLU)
    x = x_ref[...].astype(jnp.bfloat16)                                # (TB, IN)
    h1 = jnp.dot(x, w1_ref[...], preferred_element_type=jnp.float32) + b1_ref[...]
    h1 = jnp.maximum(h1, 0.0).astype(jnp.bfloat16)                     # cast only for next matmul
    # fc2 -> relu
    h2 = jnp.dot(h1, w2_ref[...], preferred_element_type=jnp.float32) + b2_ref[...]
    h2 = jnp.maximum(h2, 0.0).astype(jnp.bfloat16)
    # fc3 (no activation) -> narrow (TB, out_size) store: only useful bytes go to HBM
    o_ref[...] = (
        jnp.dot(h2, w3_ref[...], preferred_element_type=jnp.float32) + b3_ref[...]
    ).astype(o_ref.dtype)


def dqn_forward(x, kparams, *, tb=1024):
    """x: (B, input_size) float32; kparams: kernel-ready params (bf16 W, f32 b)."""
    w1, b1 = kparams["W1"], kparams["b1"]      # (in, 128) bf16, (1, 128) f32
    w2, b2 = kparams["W2"], kparams["b2"]      # (128, 64) bf16, (1, 64)  f32
    w3, b3 = kparams["W3"], kparams["b3"]      # (64, out) bf16, (1, out) f32
    B, in_size = x.shape
    h1_size, h2_size = w1.shape[1], w2.shape[1]
    out_size = w3.shape[1]

    # Batch tile: multiple of 16 (bf16 sublane packing).  If the batch is big
    # enough, keep >=2 grid steps so v7x's two TensorCores both get work.
    if B > 16:
        tb_eff = min(tb, _round_up(-(-B // 2), 16))
    else:
        tb_eff = _round_up(max(B, 1), 16)
    b_pad = _round_up(B, tb_eff)
    grid = (b_pad // tb_eff,)

    # Pad batch rows only (zero rows are sliced off below); features stay unpadded.
    x_p = x if b_pad == B else jnp.zeros((b_pad, in_size), x.dtype).at[:B].set(x)

    def batch_tiled(feat):
        # batch-tiled activation / output blocks (full, unpadded feature width)
        return pl.BlockSpec((tb_eff, feat), lambda i: (i, 0))

    def resident(arr):
        # same block index every grid step -> stays pinned in VMEM
        return pl.BlockSpec(arr.shape, lambda i: (0, 0))

    flops = 2 * b_pad * (in_size * h1_size + h1_size * h2_size + h2_size * out_size)
    bytes_accessed = (
        x_p.size * x_p.dtype.itemsize
        + sum(int(a.size) * a.dtype.itemsize for a in (w1, b1, w2, b2, w3, b3))
        + b_pad * out_size * 4
    )

    out_pad = pl.pallas_call(
        dqn_kernel,
        out_shape=jax.ShapeDtypeStruct((b_pad, out_size), jnp.float32),
        grid=grid,
        in_specs=[
            batch_tiled(in_size),
            resident(w1), resident(b1),
            resident(w2), resident(b2),
            resident(w3), resident(b3),
        ],
        out_specs=batch_tiled(out_size),
        compiler_params=pltpu.CompilerParams(
            dimension_semantics=("parallel",),
        ),
        cost_estimate=pl.CostEstimate(
            flops=int(flops), transcendentals=0, bytes_accessed=int(bytes_accessed)
        ),
    )(x_p, w1, b1, w2, b2, w3, b3)

    # slice away batch padding (feature dims are already exact)
    return out_pad[:B] if b_pad != B else out_pad


def init_params(key, input_size, output_size):
    """Deterministic f32 master params mimicking PyTorch Linear's U(-1/sqrt(fan_in), ...)."""
    sizes = [(input_size, 128), (128, 64), (64, output_size)]
    params = {}
    for i, (fan_in, fan_out) in enumerate(sizes, start=1):
        key, kw, kb = jax.random.split(key, 3)
        bound = 1.0 / jnp.sqrt(jnp.float32(fan_in))
        # stored transposed vs. PyTorch: (in, out) so the kernel does y = x @ W + b
        params[f"W{i}"] = jax.random.uniform(
            kw, (fan_in, fan_out), jnp.float32, -bound, bound
        )
        # bias kept 2D (1, out) so it broadcasts cleanly on TPU
        params[f"b{i}"] = jax.random.uniform(
            kb, (1, fan_out), jnp.float32, -bound, bound
        )
    return params


def prepare_kernel_params(params):
    """One-time prep hoisted out of the forward path: bf16 weights, f32 biases."""
    return {
        "W1": params["W1"].astype(jnp.bfloat16), "b1": params["b1"],
        "W2": params["W2"].astype(jnp.bfloat16), "b2": params["b2"],
        "W3": params["W3"].astype(jnp.bfloat16), "b3": params["b3"],
    }


def dqn_reference_f32(x, params):
    h1 = jnp.maximum(x @ params["W1"] + params["b1"], 0.0)
    h2 = jnp.maximum(h1 @ params["W2"] + params["b2"], 0.0)
    return h2 @ params["W3"] + params["b3"]


def dqn_reference_bf16(x, params):
    """Same bf16-operand / f32-accumulate recipe as the kernel (tight check)."""
    bf = jnp.bfloat16
    h1 = jnp.maximum(
        jnp.dot(x.astype(bf), params["W1"].astype(bf),
                preferred_element_type=jnp.float32) + params["b1"], 0.0)
    h2 = jnp.maximum(
        jnp.dot(h1.astype(bf), params["W2"].astype(bf),
                preferred_element_type=jnp.float32) + params["b2"], 0.0)
    return jnp.dot(h2.astype(bf), params["W3"].astype(bf),
                   preferred_element_type=jnp.float32) + params["b3"]


if __name__ == "__main__":
    key = jax.random.PRNGKey(0)
    input_size, output_size, batch = 4, 2, 8  # CartPole-like state/action dims

    key, kx = jax.random.split(key)
    x = jax.random.normal(kx, (batch, input_size), jnp.float32)
    params = init_params(key, input_size, output_size)
    kparams = prepare_kernel_params(params)   # hoisted one-time bf16 cast

    out = dqn_forward(x, kparams)
    out = jax.block_until_ready(out)
    assert out.shape == (batch, output_size)

    # Tight check vs. a reference using the same bf16-operand / f32-accum recipe.
    ref_bf16 = dqn_reference_bf16(x, params)
    assert jnp.allclose(out, ref_bf16, atol=1e-2, rtol=1e-2)

    # Looser sanity check vs. full-f32 math (bf16 operands lose ~3 decimal digits).
    ref_f32 = dqn_reference_f32(x, params)
    assert jnp.allclose(out, ref_f32, atol=5e-2, rtol=5e-2)

    print("KERNEL_OK")
</pallas_src>

<mosaic_0001>
module attributes {stable_mosaic.version = 11 : i64} {
  func.func @dqn_kernel(%arg0: i32, %arg1: memref<16x4xf32, #tpu.memory_space<vmem>>, %arg2: memref<4x128xbf16, #tpu.memory_space<vmem>>, %arg3: memref<1x128xf32, #tpu.memory_space<vmem>>, %arg4: memref<128x64xbf16, #tpu.memory_space<vmem>>, %arg5: memref<1x64xf32, #tpu.memory_space<vmem>>, %arg6: memref<64x2xbf16, #tpu.memory_space<vmem>>, %arg7: memref<1x2xf32, #tpu.memory_space<vmem>>, %arg8: memref<16x2xf32, #tpu.memory_space<vmem>>) attributes {dimension_semantics = [#tpu.dimension_semantics<parallel>], iteration_bounds = array<i64: 1>, scalar_prefetch = 0 : i64, scratch_operands = 0 : i64, tpu.core_type = #tpu.core_type<tc>, window_params = [{transform_indices = @transform_0, window_bounds = array<i64: 16, 4>}, {pipeline_mode = #tpu.pipeline_mode<synchronous>, transform_indices = @transform_1, window_bounds = array<i64: 4, 128>}, {pipeline_mode = #tpu.pipeline_mode<synchronous>, transform_indices = @transform_2, window_bounds = array<i64: 1, 128>}, {pipeline_mode = #tpu.pipeline_mode<synchronous>, transform_indices = @transform_3, window_bounds = array<i64: 128, 64>}, {pipeline_mode = #tpu.pipeline_mode<synchronous>, transform_indices = @transform_4, window_bounds = array<i64: 1, 64>}, {pipeline_mode = #tpu.pipeline_mode<synchronous>, transform_indices = @transform_5, window_bounds = array<i64: 64, 2>}, {pipeline_mode = #tpu.pipeline_mode<synchronous>, transform_indices = @transform_6, window_bounds = array<i64: 1, 2>}, {transform_indices = @transform_7, window_bounds = array<i64: 16, 2>}]} {
    %c0 = arith.constant 0 : index
    %c0_0 = arith.constant 0 : index
    %0 = vector.load %arg1[%c0, %c0_0] : memref<16x4xf32, #tpu.memory_space<vmem>>, vector<16x4xf32>
    %1 = arith.truncf %0 : vector<16x4xf32> to vector<16x4xbf16>
    %c0_1 = arith.constant 0 : index
    %c0_2 = arith.constant 0 : index
    %2 = vector.load %arg2[%c0_1, %c0_2] : memref<4x128xbf16, #tpu.memory_space<vmem>>, vector<4x128xbf16>
    %cst = arith.constant dense<0.000000e+00> : vector<16x128xf32>
    %3 = tpu.matmul %1, %2, %cst {dimension_numbers = #tpu.dot_dimension_numbers<[1], [0], [0], [1], [0, 0, 1, 1], [], []>} : vector<16x4xbf16>, vector<4x128xbf16>, vector<16x128xf32> -> vector<16x128xf32>
    %c0_3 = arith.constant 0 : index
    %c0_4 = arith.constant 0 : index
    %4 = vector.load %arg3[%c0_3, %c0_4] : memref<1x128xf32, #tpu.memory_space<vmem>>, vector<1x128xf32>
    %5 = vector.broadcast %4 : vector<1x128xf32> to vector<16x128xf32>
    %6 = arith.addf %3, %5 : vector<16x128xf32>
    %cst_5 = arith.constant 0.000000e+00 : f32
    %7 = vector.broadcast %cst_5 : f32 to vector<16x128xf32>
    %8 = arith.maximumf %6, %7 : vector<16x128xf32>
    %9 = arith.truncf %8 : vector<16x128xf32> to vector<16x128xbf16>
    %c0_6 = arith.constant 0 : index
    %c0_7 = arith.constant 0 : index
    %10 = vector.load %arg4[%c0_6, %c0_7] : memref<128x64xbf16, #tpu.memory_space<vmem>>, vector<128x64xbf16>
    %cst_8 = arith.constant dense<0.000000e+00> : vector<16x64xf32>
    %11 = tpu.matmul %9, %10, %cst_8 {dimension_numbers = #tpu.dot_dimension_numbers<[1], [0], [0], [1], [0, 0, 1, 1], [], []>} : vector<16x128xbf16>, vector<128x64xbf16>, vector<16x64xf32> -> vector<16x64xf32>
    %c0_9 = arith.constant 0 : index
    %c0_10 = arith.constant 0 : index
    %12 = vector.load %arg5[%c0_9, %c0_10] : memref<1x64xf32, #tpu.memory_space<vmem>>, vector<1x64xf32>
    %13 = vector.broadcast %12 : vector<1x64xf32> to vector<16x64xf32>
    %14 = arith.addf %11, %13 : vector<16x64xf32>
    %cst_11 = arith.constant 0.000000e+00 : f32
    %15 = vector.broadcast %cst_11 : f32 to vector<16x64xf32>
    %16 = arith.maximumf %14, %15 : vector<16x64xf32>
    %17 = arith.truncf %16 : vector<16x64xf32> to vector<16x64xbf16>
    %c0_12 = arith.constant 0 : index
    %c0_13 = arith.constant 0 : index
    %18 = vector.load %arg6[%c0_12, %c0_13] : memref<64x2xbf16, #tpu.memory_space<vmem>>, vector<64x2xbf16>
    %cst_14 = arith.constant dense<0.000000e+00> : vector<16x2xf32>
    %19 = tpu.matmul %17, %18, %cst_14 {dimension_numbers = #tpu.dot_dimension_numbers<[1], [0], [0], [1], [0, 0, 1, 1], [], []>} : vector<16x64xbf16>, vector<64x2xbf16>, vector<16x2xf32> -> vector<16x2xf32>
    %c0_15 = arith.constant 0 : index
    %c0_16 = arith.constant 0 : index
    %20 = vector.load %arg7[%c0_15, %c0_16] : memref<1x2xf32, #tpu.memory_space<vmem>>, vector<1x2xf32>
    %21 = vector.broadcast %20 : vector<1x2xf32> to vector<16x2xf32>
    %22 = arith.addf %19, %21 : vector<16x2xf32>
    %c0_17 = arith.constant 0 : index
    %c0_18 = arith.constant 0 : index
    %23 = vector.load %arg8[%c0_17, %c0_18] : memref<16x2xf32, #tpu.memory_space<vmem>>, vector<16x2xf32>
    tpu.vector_store %arg8[%c0_17, %c0_18], %22 {strides = array<i32>} : memref<16x2xf32, #tpu.memory_space<vmem>>, vector<16x2xf32>,
    return
  }
  func.func @transform_0(%arg0: i32) -> (i32, i32) {
    %c0_i32 = arith.constant 0 : i32
    %c0_i32_0 = arith.constant 0 : i32
    return %arg0, %c0_i32 : i32, i32
  }
  func.func @transform_1(%arg0: i32) -> (i32, i32) {
    %c0_i32 = arith.constant 0 : i32
    %c0_i32_0 = arith.constant 0 : i32
    %c0_i32_1 = arith.constant 0 : i32
    return %c0_i32, %c0_i32_0 : i32, i32
  }
  func.func @transform_2(%arg0: i32) -> (i32, i32) {
    %c0_i32 = arith.constant 0 : i32
    %c0_i32_0 = arith.constant 0 : i32
    %c0_i32_1 = arith.constant 0 : i32
    return %c0_i32, %c0_i32_0 : i32, i32
  }
  func.func @transform_3(%arg0: i32) -> (i32, i32) {
    %c0_i32 = arith.constant 0 : i32
    %c0_i32_0 = arith.constant 0 : i32
    %c0_i32_1 = arith.constant 0 : i32
    return %c0_i32, %c0_i32_0 : i32, i32
  }
  func.func @transform_4(%arg0: i32) -> (i32, i32) {
    %c0_i32 = arith.constant 0 : i32
    %c0_i32_0 = arith.constant 0 : i32
    %c0_i32_1 = arith.constant 0 : i32
    return %c0_i32, %c0_i32_0 : i32, i32
  }
  func.func @transform_5(%arg0: i32) -> (i32, i32) {
    %c0_i32 = arith.constant 0 : i32
    %c0_i32_0 = arith.constant 0 : i32
    %c0_i32_1 = arith.constant 0 : i32
    return %c0_i32, %c0_i32_0 : i32, i32
  }
  func.func @transform_6(%arg0: i32) -> (i32, i32) {
    %c0_i32 = arith.constant 0 : i32
    %c0_i32_0 = arith.constant 0 : i32
    %c0_i32_1 = arith.constant 0 : i32
    return %c0_i32, %c0_i32_0 : i32, i32
  }
  func.func @transform_7(%arg0: i32) -> (i32, i32) {
    %c0_i32 = arith.constant 0 : i32
    %c0_i32_0 = arith.constant 0 : i32
    return %arg0, %c0_i32 : i32, i32
  }
}

</mosaic_0001>

<bundles_post_ra>
// kernel: tpu_custom_call.1
= control target key start
LH: loop header
LB: loop body
LE: loop exit
PB: predicated region body
PF: predicated region fallthrough
CT: control target
= control target key end

     0   :  { %vm39_vm0 = vcmask 1041408   ;;  %vm35_vm1 = vcmask 31744   ;;  %vm181_vm2 = vcmask 523264   ;;  %vm199_vm3 = vcmask 15360   ;;  %s371_s1 = inlined_call_operand.vmem [shape: bf16[4,128], index: 1, kind: input, shape index: {}]   ;;  %s372_s0 = inlined_call_operand.vmem [shape: f32[16,4], index: 0, kind: input, shape index: {}]   ;;  %s373_s3 = inlined_call_operand.vmem [shape: bf16[128,64], index: 3, kind: input, shape index: {}]   ;;  %s374_s2 = inlined_call_operand.vmem [shape: f32[1,128], index: 2, kind: input, shape index: {}]   ;;  %s375_s4 = inlined_call_operand.vmem [shape: f32[1,64], index: 4, kind: input, shape index: {}]   ;;  %s376_s6 = inlined_call_operand.vmem [shape: f32[1,2], index: 6, kind: input, shape index: {}]   ;;  %s377_s5 = inlined_call_operand.vmem [shape: bf16[64,2], index: 5, kind: input, shape index: {}]   ;;  %s378_s7 = inlined_call_operand.vmem [shape: f32[16,2], index: 7, kind: output, shape index: {}]  }
   0x1   :  { %v30_v0 = vld [vmem:[%s371_s1] sm:$0x3]  ;;  %v28_v2 = vld [vmem:[%s372_s0 + $0x8] sm:$0xff]  ;;  %v263_v5 = vld [vmem:[%s373_s3 + $0x38] sm:$0xff] }
   0x2   :  { %v27_v1 = vld [vmem:[%s372_s0] sm:$0xff]  ;;  %v41_v3 = vsel %vm39_vm0, %v30_v0, 0  ;;  %128 = vmatpush.bf16.msra.mxu1 %v263_v5  ;;  %v262_v6 = vld [vmem:[%s373_s3 + $0x30] sm:$0xff]  ;;  %v261_v7 = vld [vmem:[%s373_s3 + $0x28] sm:$0xff] }
   0x3   :  { %v29_v4 = vpack.c.bf16 %v28_v2, %v27_v1  ;;  %50 = vmatpush.bf16.msra.mxu0 %v41_v3  ;;  %v260_v8 = vld [vmem:[%s373_s3 + $0x20] sm:$0xff]  ;;  %v259_v9 = vld [vmem:[%s373_s3 + $0x18] sm:$0xff]  ;;  %v258_v10 = vld [vmem:[%s373_s3 + $0x10] sm:$0xff] }
   0x4   :  { %v257_v11 = vld [vmem:[%s373_s3 + $0x8] sm:$0xff]  ;;  %v256_v12 = vld [vmem:[%s373_s3] sm:$0xff]  ;;  %v267_v21 = vld [vmem:[%s377_s5 + $0x18] sm:$0xff] }
   0x5   :  { %v268_v14 = vld [vmem:[%s374_s2] ss:$0 sm:$0xff]  ;;  %189 = vmatpush.bf16.msra.mxu2 %v267_v21  ;;  %v266_v22 = vld [vmem:[%s377_s5 + $0x10] sm:$0xff]  ;;  %v265_v23 = vld [vmem:[%s377_s5 + $0x8] sm:$0xff] }
   0x6   :  { %206 = vmatmul.msk.bf16.vlgmr.msra.gmra.mxu0 %vm35_vm1, %v29_v4  ;;  %129 = vmatpush.bf16.msra.mxu1 %v262_v6  ;;  %v264_v24 = vld [vmem:[%s377_s5] sm:$0xff] }
   0x7   :  { %v269_v26 = vld [vmem:[%s375_s4] ss:$0 sm:$0xff] }
   0x8   :  { %v270_v33 = vld [vmem:[%s376_s6] ss:$0 sm:$0xff] }
   0x9   :  { %190 = vmatpush.bf16.msra.mxu2 %v266_v22 }
   0xa   :  { %130 = vmatpush.bf16.msra.mxu1 %v261_v7 }
   0xd   :  { %191 = vmatpush.bf16.msra.mxu2 %v265_v23 }
   0xe   :  { %131 = vmatpush.bf16.msra.mxu1 %v260_v8 }
  0x11   :  { %192 = vmatpush.bf16.msra.mxu2 %v264_v24 }
  0x12   :  { %132 = vmatpush.bf16.msra.mxu1 %v259_v9 }
  0x16   :  { %133 = vmatpush.bf16.msra.mxu1 %v258_v10 }
  0x1a   :  { %134 = vmatpush.bf16.msra.mxu1 %v257_v11 }
  0x1e   :  { %135 = vmatpush.bf16.msra.mxu1 %v256_v12 }
  0x83   :  { %v52_v13 = vpop.f32.mrf.mxu0 }
  0x84   :  { %v53_v15 = vadd.f32 %v268_v14, %v52_v13 }
  0x86   :  { %v57_v18 = vmax.f32 %v53_v15, 0.0 }
  0x8b   :  { %v54_v16 = vpop.f32.mrf.mxu0 }
  0x8c   :  { %v55_v17 = vadd.f32 %v268_v14, %v54_v16 }
  0x8e   :  { %v58_v19 = vmax.f32 %v55_v17, 0.0 }
  0x90   :  { %v59_v20 = vpack.c.bf16 %v58_v19, %v57_v18 }
  0x92   :  { %136 = vmatmul.bf16.vlgmr.msra.gmra.mxu1 %v59_v20 }
 0x10f   :  { %v137_v25 = vpop.f32.mrf.mxu1 }
 0x110   :  { %v138_v27 = vadd.f32 %v269_v26, %v137_v25 }
 0x112   :  { %v142_v30 = vmax.f32 %v138_v27, 0.0 }
 0x117   :  { %v139_v28 = vpop.f32.mrf.mxu1 }
 0x118   :  { %v140_v29 = vadd.f32 %v269_v26, %v139_v28 }
 0x11a   :  { %v143_v31 = vmax.f32 %v140_v29, 0.0 }
 0x11c   :  { %v144_v32 = vpack.c.bf16 %v143_v31, %v142_v30 }
 0x11e   :  { %255 = vmatmul.msk.bf16.vlgmr.msra.gmra.mxu2 %vm181_vm2, %v144_v32 }
 0x1a1   :  { %v194_v34 = vpop.f32.mrf.mxu2 }
 0x1a2   :  { %v195_v35 = vadd.f32 %v270_v33, %v194_v34 }
 0x1a4   :  { %200 = vst.msk [vmem:[%s378_s7] sm:$0xff] %vm199_vm3, %v195_v35 }
 0x1a9   :  { %v196_v36 = vpop.f32.mrf.mxu2 }
 0x1aa   :  { %v197_v37 = vadd.f32 %v270_v33, %v196_v36 }
 0x1ac   :  { %201 = vst.msk [vmem:[%s378_s7 + $0x8] sm:$0xff] %vm199_vm3, %v197_v37 }

</bundles_post_ra>
